<compile_context>
chip_gen: v7x
topology: tpu7x:2x2x1
jax: 0.10.0
libtpu: 0.0.40
codegen_flags: <defaults>
</compile_context>

<pallas_src>
import functools

import jax
import jax.numpy as jnp
import numpy as np
from jax.experimental import pallas as pl
from jax.experimental.pallas import tpu as pltpu


def _round_up(x, m):
    return ((x + m - 1) // m) * m


def _softplus(x):
    # log(1 + exp(x)) computed stably (== logaddexp(x, 0))
    return jnp.maximum(x, 0.0) + jnp.log1p(jnp.exp(-jnp.abs(x)))


def _vmem_capacity_bytes():
    """Per-core VMEM capacity; conservative 64 MiB (v7x) fallback."""
    try:
        info = pltpu.get_tpu_info()
        cap = getattr(info, "vmem_capacity_bytes", None)
        if cap:
            return int(cap)
    except Exception:
        pass
    return 64 * 1024 * 1024


def _learned_mixin_kernel(scalars_ref, factor_ref, logits_ref, labels_ref,
                          bias_ref, *rest, use_miu, fold_rows, row_mask,
                          tile_rows, b_valid):
    """One (tile_rows, N) row tile of the LearnedMixin loss.

    rest = (miu_ref, mask_ref, out_ref) if use_miu else (out_ref,)
    out block: (1, 8, N) sublane-folded partial sums when fold_rows, else the
    raw (1, tile_rows, N) per-element losses (tiny nt==1 / B<8 case).
    """
    if use_miu:
        miu_ref, mask_ref, out_ref = rest
    else:
        (out_ref,) = rest

    add_const = scalars_ref[0]             # constant_smooth (+ sigmoid(a))

    f32 = jnp.float32
    logits = logits_ref[...].astype(f32)   # (TB, N)
    labels = labels_ref[...].astype(f32)
    bias = bias_ref[...].astype(f32)
    factor = factor_ref[...].astype(f32)   # (TB, 1), lane-broadcast below

    # ---- bias_convert (factor = softplus(bias_lin(hidden)) precomputed) ----
    # NOTE: matches PyTorch reference; if use_smooth=False and
    # constant_smooth==0, bias==0 gives log(0) = -inf just like the reference.
    bias_c0 = jnp.log(bias + add_const) * factor
    bias_c1 = jnp.log((1.0 - bias) + add_const) * factor

    # ---- convert_sigmoid_logits_to_binary_logprobs ----
    log_prob = -_softplus(-logits)
    log_one_minus_prob = -logits + log_prob

    # ---- add bias, renormalize_binary_logits (trimmed epilogue) ----
    a = bias_c0 + log_prob
    c = bias_c1 + log_one_minus_prob
    d = a - c
    norm = jnp.maximum(a, c) + jnp.log1p(jnp.exp(-jnp.abs(d)))
    # loss == -((a-norm)*labels + (1-labels)*(c-norm)) == (norm-c) - labels*d
    loss = (norm - c) - labels * d

    if use_miu:
        miu = miu_ref[...].astype(f32)
        mask = mask_ref[...].astype(f32)
        mv = miu * mask
        sm = (miu - mv) + jnp.minimum(_softplus(mv), 100.0)
        loss = loss * sm

    # ---- mask undefined rows of a partial edge tile (select BEFORE fold) ----
    if row_mask:
        row0 = pl.program_id(0) * tile_rows
        rows = row0 + jax.lax.broadcasted_iota(jnp.int32, (tile_rows, 1), 0)
        loss = jnp.where(rows < b_valid, loss, 0.0)

    if fold_rows:
        # fold the tile to an (8, N) sublane-dense partial sum
        part = loss[0:8, :]
        for g in range(1, tile_rows // 8):
            part = part + loss[g * 8:(g + 1) * 8, :]
        out_ref[0] = part
    else:
        # tiny single-tile batch (tile_rows == B, not a multiple of 8)
        out_ref[0] = loss


def learned_mixin_loss(logits, labels, bias, hidden, w, lin_b, smooth_param,
                       *, constant_smooth=0.0, use_smooth=True,
                       miu=None, mask=None, tile_rows=None,
                       vmem_budget_bytes=None):
    """Pallas implementation of LearnedMixin.forward (returns scalar loss).

    dtype policy: the (B,N) streams (logits/labels/bias/miu/mask) are streamed
    from HBM in the dtype they arrive in; pass bf16 only if the producer
    already emits bf16 (a wrapper-side cast would add its own HBM pass).
    """
    B, N = logits.shape
    use_miu = miu is not None

    # --- hoisted prep (trivial cost, stays in plain JAX) ---
    factor = jax.nn.softplus(
        jnp.dot(hidden.astype(jnp.float32), w.astype(jnp.float32))
        + jnp.asarray(lin_b, jnp.float32).reshape(()))            # (B, 1)
    add_const = jnp.float32(constant_smooth)
    if use_smooth:
        add_const = add_const + jax.nn.sigmoid(
            jnp.asarray(smooth_param, jnp.float32).reshape(()))
    scalars = jnp.reshape(add_const, (1,)).astype(jnp.float32)

    bn_streams = [logits, labels, bias] + ([miu, mask] if use_miu else [])
    n_bn = len(bn_streams)

    # --- generation- and dtype-aware row-tile sizing (no HBM padding) ---
    cap = _vmem_capacity_bytes()
    budget = int(vmem_budget_bytes) if vmem_budget_bytes else int(cap * 0.45)
    budget = min(budget, int(cap * 0.6))
    stream_row_bytes = sum(N * int(x.dtype.itemsize) for x in bn_streams) \
        + int(factor.dtype.itemsize)
    n_work = 12                      # bound on live f32 (TB, N) temporaries
    row_cost = 2 * stream_row_bytes + n_work * N * 4   # 2x: double-buffer DMA
    tb_max = budget // max(row_cost, 1)
    tb_max = max(8, min(1024, (int(tb_max) // 8) * 8))
    # TODO(synk): add a second (column-tile) grid axis when even an 8-row tile
    # of all streams exceeds the VMEM budget (extremely large N).

    if tile_rows is not None:
        tb = min(_round_up(max(int(tile_rows), 1), 8), B)
    else:
        nt = max(1, -(-B // tb_max))
        if B >= 16:
            nt = max(nt, 2)          # keep both v7x TensorCores busy
            if nt % 2:
                nt += 1              # prefer an even megacore split
        tb = -(-B // nt)             # balanced rows per tile
        if nt > 1:
            tb = _round_up(tb, 8)
        else:
            tb = B
    nt = -(-B // tb)
    if nt == 1:
        tb = B                       # full-dim block is always legal

    needs_row_mask = (B % tb != 0)   # only the last tile can be partial
    fold_rows = (tb % 8 == 0)
    out_rows = 8 if fold_rows else tb

    bn_spec = pl.BlockSpec((tb, N), lambda i, s: (i, 0))
    in_specs = [pl.BlockSpec((tb, 1), lambda i, s: (i, 0))] + [bn_spec] * n_bn
    out_spec = pl.BlockSpec((1, out_rows, N), lambda i, s: (i, 0, 0))

    kernel = functools.partial(_learned_mixin_kernel, use_miu=use_miu,
                               fold_rows=fold_rows, row_mask=needs_row_mask,
                               tile_rows=tb, b_valid=B)

    # explicit VMEM budget from the real working set (+ slack), capped below
    # the physical capacity of the current TPU generation.
    in_tile = tb * stream_row_bytes
    work = n_work * tb * N * 4
    out_tile = out_rows * N * 4
    vmem_limit = 2 * in_tile + work + 2 * out_tile + (8 << 20)
    vmem_limit = int(min(max(vmem_limit, 32 << 20), cap - (8 << 20)))

    in_bytes = sum(int(x.size) * int(x.dtype.itemsize) for x in bn_streams) \
        + int(factor.size) * 4 + 4
    out_bytes = nt * out_rows * N * 4
    cost = pl.CostEstimate(
        flops=int((40 if use_miu else 30) * B * N),
        transcendentals=int((8 if use_miu else 6) * B * N),
        bytes_accessed=int(in_bytes + out_bytes))

    partials = pl.pallas_call(
        kernel,
        out_shape=jax.ShapeDtypeStruct((nt, out_rows, N), jnp.float32),
        grid_spec=pltpu.PrefetchScalarGridSpec(
            num_scalar_prefetch=1,
            grid=(nt,),
            in_specs=in_specs,
            out_specs=out_spec,
        ),
        compiler_params=pltpu.CompilerParams(
            dimension_semantics=("parallel",),
            vmem_limit_bytes=vmem_limit),
        cost_estimate=cost,
    )(scalars, factor, *bn_streams)

    # loss_single.sum(1).mean(0)  ==  sum(all valid elements) / B
    return jnp.sum(partials) / B


def _reference_loss(logits, labels, bias, hidden, w, lin_b, smooth_param,
                    constant_smooth, use_smooth, miu=None, mask=None):
    """Plain-JAX mirror of the PyTorch module (for verification)."""
    f32 = jnp.float32
    logits = logits.astype(f32)
    labels = labels.astype(f32)
    bias = bias.astype(f32)
    hidden = hidden.astype(f32)
    factor = jax.nn.softplus(hidden @ w.astype(f32)
                             + jnp.asarray(lin_b, f32).reshape(()))  # (B, 1)
    bias_st = jnp.stack([bias, 1.0 - bias], axis=2) + constant_smooth
    if use_smooth:
        bias_st = bias_st + jax.nn.sigmoid(
            jnp.asarray(smooth_param, f32).reshape(()))
    bias_conv = jnp.log(bias_st) * factor[:, None, :]                # (B,N,2)
    log_prob = -jax.nn.softplus(-logits)
    log_1m = -logits + log_prob
    lg = bias_conv + jnp.stack([log_prob, log_1m], axis=2)
    a, b = lg[:, :, 0], lg[:, :, 1]
    norm = jnp.maximum(a, b) + jnp.log1p(jnp.exp(-jnp.abs(a - b)))
    loss_single = -((a - norm) * labels + (1.0 - labels) * (b - norm))
    if miu is not None:
        miu = miu.astype(f32)
        mask = mask.astype(f32)
        sm = miu * (1.0 - mask) + jnp.minimum(jax.nn.softplus(miu * mask),
                                              100.0)
        loss_single = loss_single * sm
    return loss_single.sum(1).mean(0)


if __name__ == "__main__":
    B, N, H = 2, 8, 32              # batch, num answers, hid_size
    smooth_init = -1.0
    constant_smooth = 0.0

    key = jax.random.PRNGKey(0)
    k1, k2, k3, k4, k5, k6, k7 = jax.random.split(key, 7)

    logits = jax.random.normal(k1, (B, N), jnp.float32)
    labels = (jax.random.uniform(k2, (B, N)) > 0.5).astype(jnp.float32)
    bias = jax.random.uniform(k3, (B, N), jnp.float32, minval=0.05, maxval=0.95)
    hidden = jax.random.normal(k4, (B, H), jnp.float32)

    # Deterministic params (bias_lin: Linear(H, 1); smooth_param = smooth_init)
    w = jax.random.normal(k5, (H, 1), jnp.float32) * (1.0 / np.sqrt(H))
    lin_b = jnp.zeros((1,), jnp.float32)
    smooth_param = jnp.full((1,), smooth_init, jnp.float32)

    miu = jax.random.normal(k6, (B, N), jnp.float32)
    mask = (jax.random.uniform(k7, (B, N)) > 0.5).astype(jnp.float32)

    # --- path without miu/mask (single tile, B < 8 -> unfolded output) ---
    out = learned_mixin_loss(logits, labels, bias, hidden, w, lin_b,
                             smooth_param, constant_smooth=constant_smooth,
                             use_smooth=True)
    out = jax.block_until_ready(out)
    ref = _reference_loss(logits, labels, bias, hidden, w, lin_b, smooth_param,
                          constant_smooth, True)
    np.testing.assert_allclose(np.asarray(out), np.asarray(ref),
                               rtol=1e-5, atol=2e-5)

    # --- path with miu/mask ---
    out_m = learned_mixin_loss(logits, labels, bias, hidden, w, lin_b,
                               smooth_param, constant_smooth=constant_smooth,
                               use_smooth=True, miu=miu, mask=mask)
    out_m = jax.block_until_ready(out_m)
    ref_m = _reference_loss(logits, labels, bias, hidden, w, lin_b,
                            smooth_param, constant_smooth, True,
                            miu=miu, mask=mask)
    np.testing.assert_allclose(np.asarray(out_m), np.asarray(ref_m),
                               rtol=1e-5, atol=2e-5)

    # --- multi-tile grid path (partial last tile, unaligned N, bf16 HBM
    #     inputs produced upstream) ---
    B2, N2 = 20, 200
    j1, j2, j3, j4, _, j6, j7 = jax.random.split(jax.random.PRNGKey(1), 7)
    logits2 = jax.random.normal(j1, (B2, N2), jnp.float32)
    labels2 = (jax.random.uniform(j2, (B2, N2)) > 0.5).astype(jnp.float32)
    bias2 = jax.random.uniform(j3, (B2, N2), jnp.float32,
                               minval=0.05, maxval=0.95)
    hidden2 = jax.random.normal(j4, (B2, H), jnp.float32)
    miu2 = jax.random.normal(j6, (B2, N2), jnp.float32)
    mask2 = (jax.random.uniform(j7, (B2, N2)) > 0.5).astype(jnp.float32)

    bf = jnp.bfloat16
    out2 = learned_mixin_loss(
        logits2.astype(bf), labels2.astype(bf), bias2.astype(bf),
        hidden2.astype(bf), w, lin_b, smooth_param,
        constant_smooth=constant_smooth, use_smooth=True,
        miu=miu2.astype(bf), mask=mask2.astype(bf),
        tile_rows=8)                        # force num_tiles > 1 + row mask
    out2 = jax.block_until_ready(out2)
    ref2 = _reference_loss(
        logits2.astype(bf), labels2.astype(bf), bias2.astype(bf),
        hidden2.astype(bf), w, lin_b, smooth_param,
        constant_smooth, True, miu=miu2.astype(bf), mask=mask2.astype(bf))
    np.testing.assert_allclose(np.asarray(out2), np.asarray(ref2),
                               rtol=5e-4, atol=5e-4)

    # --- default (auto-tiled) multi-tile path, f32, B >= 16 -> >= 2 tiles ---
    out3 = learned_mixin_loss(logits2, labels2, bias2, hidden2, w, lin_b,
                              smooth_param, constant_smooth=constant_smooth,
                              use_smooth=True, miu=miu2, mask=mask2)
    out3 = jax.block_until_ready(out3)
    ref3 = _reference_loss(logits2, labels2, bias2, hidden2, w, lin_b,
                           smooth_param, constant_smooth, True,
                           miu=miu2, mask=mask2)
    np.testing.assert_allclose(np.asarray(out3), np.asarray(ref3),
                               rtol=1e-5, atol=2e-5)

    print("KERNEL_OK")
</pallas_src>

<mosaic_0001>
module attributes {stable_mosaic.version = 11 : i64} {
  func.func @_learned_mixin_kernel(%arg0: i32, %arg1: memref<1xf32, #tpu.memory_space<smem>>, %arg2: memref<2x1xf32, #tpu.memory_space<vmem>>, %arg3: memref<2x8xf32, #tpu.memory_space<vmem>>, %arg4: memref<2x8xf32, #tpu.memory_space<vmem>>, %arg5: memref<2x8xf32, #tpu.memory_space<vmem>>, %arg6: memref<1x2x8xf32, #tpu.memory_space<vmem>>) attributes {dimension_semantics = [#tpu.dimension_semantics<parallel>], iteration_bounds = array<i64: 1>, scalar_prefetch = 1 : i64, scratch_operands = 0 : i64, tpu.core_type = #tpu.core_type<tc>, window_params = [{transform_indices = @transform_0, window_bounds = array<i64: 2, 1>}, {transform_indices = @transform_1, window_bounds = array<i64: 2, 8>}, {transform_indices = @transform_2, window_bounds = array<i64: 2, 8>}, {transform_indices = @transform_3, window_bounds = array<i64: 2, 8>}, {transform_indices = @transform_4, window_bounds = array<i64: 1, 2, 8>}]} {
    %c0 = arith.constant 0 : index
    %0 = memref.load %arg1[%c0] : memref<1xf32, #tpu.memory_space<smem>>
    %c0_0 = arith.constant 0 : index
    %c0_1 = arith.constant 0 : index
    %1 = vector.load %arg3[%c0_0, %c0_1] : memref<2x8xf32, #tpu.memory_space<vmem>>, vector<2x8xf32>
    %c0_2 = arith.constant 0 : index
    %c0_3 = arith.constant 0 : index
    %2 = vector.load %arg4[%c0_2, %c0_3] : memref<2x8xf32, #tpu.memory_space<vmem>>, vector<2x8xf32>
    %c0_4 = arith.constant 0 : index
    %c0_5 = arith.constant 0 : index
    %3 = vector.load %arg5[%c0_4, %c0_5] : memref<2x8xf32, #tpu.memory_space<vmem>>, vector<2x8xf32>
    %c0_6 = arith.constant 0 : index
    %c0_7 = arith.constant 0 : index
    %4 = vector.load %arg2[%c0_6, %c0_7] : memref<2x1xf32, #tpu.memory_space<vmem>>, vector<2x1xf32>
    %5 = vector.broadcast %0 : f32 to vector<2x8xf32>
    %6 = arith.addf %3, %5 : vector<2x8xf32>
    %7 = math.log %6 : vector<2x8xf32>
    %8 = vector.broadcast %4 : vector<2x1xf32> to vector<2x8xf32>
    %9 = arith.mulf %7, %8 : vector<2x8xf32>
    %cst = arith.constant 1.000000e+00 : f32
    %10 = vector.broadcast %cst : f32 to vector<2x8xf32>
    %11 = arith.subf %10, %3 : vector<2x8xf32>
    %12 = vector.broadcast %0 : f32 to vector<2x8xf32>
    %13 = arith.addf %11, %12 : vector<2x8xf32>
    %14 = math.log %13 : vector<2x8xf32>
    %15 = vector.broadcast %4 : vector<2x1xf32> to vector<2x8xf32>
    %16 = arith.mulf %14, %15 : vector<2x8xf32>
    %cst_8 = arith.constant 0.000000e+00 : f32
    %17 = vector.broadcast %cst_8 : f32 to vector<2x8xf32>
    %18 = arith.subf %17, %1 : vector<2x8xf32>
    %cst_9 = arith.constant 0.000000e+00 : f32
    %19 = vector.broadcast %cst_9 : f32 to vector<2x8xf32>
    %20 = arith.maximumf %18, %19 : vector<2x8xf32>
    %21 = math.absf %18 : vector<2x8xf32>
    %cst_10 = arith.constant 0.000000e+00 : f32
    %22 = vector.broadcast %cst_10 : f32 to vector<2x8xf32>
    %23 = arith.subf %22, %21 : vector<2x8xf32>
    %24 = math.exp %23 : vector<2x8xf32>
    %25 = math.log1p %24 : vector<2x8xf32>
    %26 = arith.addf %20, %25 : vector<2x8xf32>
    %cst_11 = arith.constant 0.000000e+00 : f32
    %27 = vector.broadcast %cst_11 : f32 to vector<2x8xf32>
    %28 = arith.subf %27, %26 : vector<2x8xf32>
    %cst_12 = arith.constant 0.000000e+00 : f32
    %29 = vector.broadcast %cst_12 : f32 to vector<2x8xf32>
    %30 = arith.subf %29, %1 : vector<2x8xf32>
    %31 = arith.addf %30, %28 : vector<2x8xf32>
    %32 = arith.addf %9, %28 : vector<2x8xf32>
    %33 = arith.addf %16, %31 : vector<2x8xf32>
    %34 = arith.subf %32, %33 : vector<2x8xf32>
    %35 = arith.maximumf %32, %33 : vector<2x8xf32>
    %36 = math.absf %34 : vector<2x8xf32>
    %cst_13 = arith.constant 0.000000e+00 : f32
    %37 = vector.broadcast %cst_13 : f32 to vector<2x8xf32>
    %38 = arith.subf %37, %36 : vector<2x8xf32>
    %39 = math.exp %38 : vector<2x8xf32>
    %40 = math.log1p %39 : vector<2x8xf32>
    %41 = arith.addf %35, %40 : vector<2x8xf32>
    %42 = arith.subf %41, %33 : vector<2x8xf32>
    %43 = arith.mulf %2, %34 : vector<2x8xf32>
    %44 = arith.subf %42, %43 : vector<2x8xf32>
    %c0_14 = arith.constant 0 : index
    %c0_15 = arith.constant 0 : index
    %c0_16 = arith.constant 0 : index
    %45 = vector.load %arg6[%c0_14, %c0_15, %c0_16] : memref<1x2x8xf32, #tpu.memory_space<vmem>>, vector<1x2x8xf32>
    %46 = vector.shape_cast %45 : vector<1x2x8xf32> to vector<2x8xf32>
    %47 = vector.shape_cast %44 : vector<2x8xf32> to vector<1x2x8xf32>
    tpu.vector_store %arg6[%c0_14, %c0_15, %c0_16], %47 {strides = array<i32>} : memref<1x2x8xf32, #tpu.memory_space<vmem>>, vector<1x2x8xf32>,
    return
  }
  func.func @transform_0(%arg0: i32, %arg1: memref<1xf32, #tpu.memory_space<smem>>) -> (i32, i32) {
    %c0_i32 = arith.constant 0 : i32
    %c0_i32_0 = arith.constant 0 : i32
    return %arg0, %c0_i32 : i32, i32
  }
  func.func @transform_1(%arg0: i32, %arg1: memref<1xf32, #tpu.memory_space<smem>>) -> (i32, i32) {
    %c0_i32 = arith.constant 0 : i32
    %c0_i32_0 = arith.constant 0 : i32
    return %arg0, %c0_i32 : i32, i32
  }
  func.func @transform_2(%arg0: i32, %arg1: memref<1xf32, #tpu.memory_space<smem>>) -> (i32, i32) {
    %c0_i32 = arith.constant 0 : i32
    %c0_i32_0 = arith.constant 0 : i32
    return %arg0, %c0_i32 : i32, i32
  }
  func.func @transform_3(%arg0: i32, %arg1: memref<1xf32, #tpu.memory_space<smem>>) -> (i32, i32) {
    %c0_i32 = arith.constant 0 : i32
    %c0_i32_0 = arith.constant 0 : i32
    return %arg0, %c0_i32 : i32, i32
  }
  func.func @transform_4(%arg0: i32, %arg1: memref<1xf32, #tpu.memory_space<smem>>) -> (i32, i32, i32) {
    %c0_i32 = arith.constant 0 : i32
    %c0_i32_0 = arith.constant 0 : i32
    %c0_i32_1 = arith.constant 0 : i32
    return %arg0, %c0_i32, %c0_i32_0 : i32, i32, i32
  }
}

</mosaic_0001>

<bundles_post_ra>
// kernel: tpu_custom_call.1
= control target key start
LH: loop header
LB: loop body
LE: loop exit
PB: predicated region body
PF: predicated region fallthrough
CT: control target
= control target key end

     0   :  { %v134_v1 = vmov 0   ;;  %s193_s0 = inlined_call_operand.<no memory space> [shape: f32[1], index: 0, kind: input, shape index: {}]   ;;  %s194_s1 = inlined_call_operand.vmem [shape: f32[2,1], index: 1, kind: input, shape index: {}]   ;;  %s195_s2 = inlined_call_operand.vmem [shape: f32[2,8], index: 2, kind: input, shape index: {}]   ;;  %s196_s3 = inlined_call_operand.vmem [shape: f32[2,8], index: 3, kind: input, shape index: {}]   ;;  %s197_s4 = inlined_call_operand.vmem [shape: f32[2,8], index: 4, kind: input, shape index: {}]   ;;  %s198_s5 = inlined_call_operand.hbm [shape: f32[1,2,8], index: 5, kind: output, shape index: {}]  }
   0x1   :  { %v24_v0 = vld [vmem:[%s194_s1] sm:$0x3]  ;;  %97 = vset.pattern.permute.xlu0 %v134_v1 }
   0x2   :  { %11 = vsyncpa [#allocation5], 0  ;;  %31 = vperm.xlu0 %97, %v24_v0   ;;  %v21_v2 = vld [vmem:[%s195_s2] sm:$0x3]  ;;  %v25_v10 = vstv %s193_s0  ;;  %vm79_vm2 = vcmask 58368  }
   0x3   :  { %v40_v3 = vsub.f32 0.0, %v21_v2  ;;  %v23_v9 = vld [vmem:[%s197_s4] sm:$0x3]  ;;  %s135_s4 = smov [#allocation4]  }
   0x4   :  { %v35_v11 = vsub.f32 1.0, %v23_v9  ;;  %v26_v13 = vadd.f32 %v25_v10, %v23_v9  ;;  %v22_v48 = vld [vmem:[%s196_s3] sm:$0x3]  ;;  %s87_s25 = sshll.u32 %s135_s4, 4  ;;  %s88_s25 = int_to_ptr.vmem [resolvable:$true] %s87_s25 }
   0x5   :  { %v42_v4 = vand.u32 2147483647, %v40_v3  ;;  %v41_v20 = vmax.f32 %v40_v3, 0.0  ;;  %s110_s26 = scalar_lea.vmem %s88_s25, 32  ;;  %p115_p1 = scmp.lt.s32.totalorder %s88_s25, %s88_s25 }
   0x6   :  { %v36_v14 = vadd.f32 %v35_v11, %v25_v10  ;;  %p111_p0 = scmp.ne.s32.totalorder %s88_s25, %s110_s26  ;;  %p116_p2 = scmp.lt.s32.totalorder %s110_s26, %s110_s26 }
   0x7   :  { %v43_v5 = vsub.f32 0.0, %v42_v4 }
   0x8   :  { %p117_p3 = por %p116_p2, %p115_p1 }
   0x9   :  { %v44_v6 = vmul.f32 1.442695, %v43_v5 }
   0xa   :  { %p118_p4 = pnand %p117_p3, %p111_p0 }
   0xb   :  { %98 = vpow2.f32 %v44_v6 }
  0x15   :  { %v99_v7 = vpop.eup %98 }
  0x16   :  { %v46_v8 = vadd.f32 1.0, %v99_v7  ;;  %v49_v12 = vmul.f32 -0.5, %v99_v7  ;;  %v52_v17 = vand.u32 2147483647, %v99_v7 }
  0x18   :  { %100 = vlog2.f32 %v46_v8  ;;  %v50_v15 = vadd.f32 1.0, %v49_v12  ;;  %vm53_vm0 = vcmp.lt.f32.partialorder %v52_v17, 0.0004427343 }
  0x19   :  { %102 = vlog2.f32 %v26_v13 }
  0x1a   :  { %104 = vlog2.f32 %v36_v14  ;;  %v51_v19 = vmul.f32 %v99_v7, %v50_v15 }
  0x22   :  { %v101_v16 = vpop.eup %100 }
  0x23   :  { %v48_v18 = vmul.f32 0.6931472, %v101_v16  ;;  %v103_v23 = vpop.eup %102 }
  0x24   :  { %v105_v24 = vpop.eup %104  ;;  %v28_v26 = vmul.f32 0.6931472, %v103_v23 }
  0x25   :  { %v54_v21 = vsel %vm53_vm0, %v51_v19, %v48_v18  ;;  %v38_v27 = vmul.f32 0.6931472, %v105_v24 }
  0x26   :  { %v55_v22 = vadd.f32 %v54_v21, %v41_v20 }
  0x28   :  { %v56_v25 = vsub.f32 0.0, %v55_v22 }
  0x2a   :  { %v57_v28 = vadd.f32 %v56_v25, %v40_v3 }
  0x81   :  { %v32_v29 = vpop.permute.xlu0 %31 }
  0x82   :  { %v34_v30 = vmul.f32 %v32_v29, %v28_v26  ;;  %v39_v31 = vmul.f32 %v38_v27, %v32_v29 }
  0x84   :  { %v58_v32 = vadd.f32 %v56_v25, %v34_v30  ;;  %v59_v33 = vadd.f32 %v57_v28, %v39_v31 }
  0x86   :  { %v60_v34 = vsub.f32 %v58_v32, %v59_v33  ;;  %v61_v46 = vmax.f32 %v58_v32, %v59_v33 }
  0x88   :  { %v62_v35 = vand.u32 2147483647, %v60_v34  ;;  %v77_v51 = vmul.f32 %v60_v34, %v22_v48 }
  0x8a   :  { %v63_v36 = vsub.f32 0.0, %v62_v35 }
  0x8c   :  { %v64_v37 = vmul.f32 1.442695, %v63_v36 }
  0x8e   :  { %106 = vpow2.f32 %v64_v37 }
  0x98   :  { %v107_v38 = vpop.eup %106 }
  0x99   :  { %v66_v39 = vadd.f32 1.0, %v107_v38  ;;  %v69_v40 = vmul.f32 -0.5, %v107_v38  ;;  %v72_v42 = vand.u32 2147483647, %v107_v38 }
  0x9b   :  { %108 = vlog2.f32 %v66_v39  ;;  %v70_v41 = vadd.f32 1.0, %v69_v40  ;;  %vm73_vm1 = vcmp.lt.f32.partialorder %v72_v42, 0.0004427343 }
  0x9d   :  { %v71_v45 = vmul.f32 %v107_v38, %v70_v41 }
  0xa5   :  { %v109_v43 = vpop.eup %108 }
  0xa6   :  { %v68_v44 = vmul.f32 0.6931472, %v109_v43 }
  0xa8   :  { %v74_v47 = vsel %vm73_vm1, %v71_v45, %v68_v44 }
  0xa9   :  { %v75_v49 = vadd.f32 %v74_v47, %v61_v46 }
  0xab   :  { %v76_v50 = vsub.f32 %v75_v49, %v59_v33 }
  0xad   :  { %v78_v52 = vsub.f32 %v76_v50, %v77_v51 }
  0xaf   :  { %80 = vst.msk [vmem:[#allocation4] sm:$0x3] %vm79_vm2, %v78_v52 }
  0xb0   :  { %121 = shalt.err (!%p118_p4)
}
  0xb1   :  { %s122_s3 = scalar_lea.hbm %s198_s5, 32 }
  0xb2   :  { %p123_p5 = scmp.ne.s32.totalorder %s198_s5, %s122_s3  ;;  %p126_p6 = scmp.lt.u32.totalorder %s122_s3, %s198_s5 }
  0xb4   :  { %p128_p7 = pnand %p126_p6, %p123_p5 }
  0xb6   :  { %131 = shalt.err (!%p128_p7)
}
  0xb7   :  { %90 = dma.vmem_to_hbm [thread:$0]  %s88_s25, 32, %s198_s5, [#allocation5]  }
  0xb8   :  { %132 = dma.done.wait [#allocation5], 32  }
  0xb9   :  { %133 = vsyncadd [#allocation5], 4294967264 }
  0xba   :  { %94 = vsyncpa [#allocation5], 1 }

</bundles_post_ra>
